<compile_context>
chip_gen: v7x
topology: tpu7x:2x2x1
jax: 0.10.0
libtpu: 0.0.40
codegen_flags: <defaults>
</compile_context>

<pallas_src>
import functools

import jax
import jax.numpy as jnp
from jax.experimental import pallas as pl
from jax.experimental.pallas import tpu as pltpu


def _round_up(x, m):
    return (x + m - 1) // m * m


def _vmem_block_bytes(shape, dtype):
    """Approx VMEM bytes of one buffer: last two dims padded to the (8,128) tile."""
    dims = list(shape)
    while len(dims) < 2:
        dims.insert(0, 1)
    dims[-1] = _round_up(dims[-1], 128)
    dims[-2] = _round_up(dims[-2], 8)
    n = 1
    for d in dims:
        n *= int(d)
    return n * jnp.dtype(dtype).itemsize


def _patch_embed_kernel(x_ref, wd_ref, s_ref, m_ref, b_ref, o_ref):
    # x_ref : (1, C*Hp, P*W)  one image, rows=(c, patch-row), cols=(p, w)   [input dtype]
    # wd_ref: (C*Hp, P*W)     depthwise weights tiled to exactly x's layout [compute dtype]
    # s_ref : (P*W, Wp)       0/1 within-patch pooling matrix               [compute dtype]
    # m_ref : (TO, C*Hp)      pointwise weight (x) eye(Hp), row tile        [compute dtype]
    # b_ref : (TO, 1)         fused bias (b_pw + w_pw @ b_dw), per out row  [f32]
    # o_ref : (1, TO, Wp)     output row tile                               [out dtype]
    prod = (x_ref[0] * wd_ref[...]).astype(s_ref.dtype)               # VPU (mul in f32)
    r1 = jnp.dot(prod, s_ref[...], preferred_element_type=jnp.float32)  # MXU: patch sums
    out = jnp.dot(m_ref[...], r1.astype(m_ref.dtype),
                  preferred_element_type=jnp.float32)                   # MXU: pointwise
    o_ref[0] = (out + b_ref[...]).astype(o_ref.dtype)                   # f32 epilogue


@functools.partial(jax.jit, static_argnames=("patch_size", "compute_dtype", "row_block"))
def patch_embeddings_forward(x, w_dw, b_dw, w_pw, b_pw, *, patch_size,
                             compute_dtype=jnp.bfloat16, row_block=None):
    """x: (N, C, H, W) NCHW.  Returns (N, O, H//P, W//P) NCHW in x.dtype."""
    N, C, H, W = x.shape
    P = int(patch_size)
    Hp, Wp = H // P, W // P
    O = w_pw.shape[0]
    out_dtype = x.dtype
    f32 = jnp.float32

    # PyTorch strided-conv semantics: rows/cols not filling a full patch are
    # dropped.  Trailing H rows must be sliced so the free (C,Hp,P,W) split is
    # valid; trailing W cols are never selected by the pooling matrix.
    if H != Hp * P:
        x = x[:, :, :Hp * P, :]
        H = Hp * P

    CHp, PW, OHp = C * Hp, P * W, O * Hp

    # ---- free (metadata-only) reshape of the input: no HBM traffic ----
    x3 = x.reshape(N, CHp, PW)

    # ---- host-side weight prep (tiny; a real module would cache these) ----
    wd = w_dw.reshape(C, P, P).astype(f32)
    reps = -(-W // P)                                       # ceil(W / P)
    wd_row = jnp.tile(wd, (1, 1, reps))[:, :, :W]           # (C, P, W): [c,p,w%P]
    wd_full = jnp.broadcast_to(wd_row[:, None, :, :], (C, Hp, P, W))
    wd_full = wd_full.reshape(CHp, PW).astype(compute_dtype)

    # 0/1 pooling matrix: column (p, w) feeds output col j iff w // P == j
    w_idx = jnp.arange(PW, dtype=jnp.int32) % W
    pool = (w_idx[:, None] // P == jnp.arange(Wp, dtype=jnp.int32)[None, :])
    pool = pool.astype(compute_dtype)                       # (PW, Wp)

    # pointwise weight expanded over patch rows: M[(o,i'),(c,i)] = w_pw[o,c]*[i==i']
    wp_mat = w_pw.reshape(O, C).astype(f32)
    m_full = (wp_mat[:, None, :, None] * jnp.eye(Hp, dtype=f32)[None, :, None, :])
    m_full = m_full.reshape(OHp, CHp).astype(compute_dtype)

    # fused bias: b[o] = b_pw[o] + sum_c w_pw[o,c] * b_dw[c], repeated over patch rows
    b_f = b_pw.astype(f32) + wp_mat @ b_dw.astype(f32)
    b_full = jnp.broadcast_to(b_f[:, None], (O, Hp)).reshape(OHp, 1)

    # ---- output-row tiling: keep the pointwise matrix VMEM-friendly on v7x ----
    if row_block is None:
        m_bytes = _vmem_block_bytes((OHp, CHp), compute_dtype)
        row_block = OHp if 2 * m_bytes <= 8 * 2**20 else 256   # 256 rows ~ MXU width
    TO = OHp if int(row_block) >= OHp else max(8, (int(row_block) // 8) * 8)
    n_rows = pl.cdiv(OHp, TO)

    # ---- VMEM budget: 2 buffers per operand (constant-index blocks included) ----
    buf_bytes = (_vmem_block_bytes((1, CHp, PW), x.dtype)
                 + _vmem_block_bytes((CHp, PW), compute_dtype)
                 + _vmem_block_bytes((PW, Wp), compute_dtype)
                 + _vmem_block_bytes((TO, CHp), compute_dtype)
                 + _vmem_block_bytes((TO, 1), f32)
                 + _vmem_block_bytes((1, TO, Wp), out_dtype))
    need = 2 * buf_bytes
    try:
        cap = int(pltpu.get_tpu_info().vmem_capacity_bytes)   # 128 MiB v5e/v6e, 64 MiB v7x
    except Exception:
        cap = 64 * 2**20                                      # v7x-safe fallback
    vmem_limit = int(min(max(need * 3 // 2, 16 * 2**20), max(cap - 2 * 2**20, 16 * 2**20)))

    csize = jnp.dtype(compute_dtype).itemsize
    xsize = jnp.dtype(x.dtype).itemsize
    osize = jnp.dtype(out_dtype).itemsize
    cost = pl.CostEstimate(
        flops=int(N * (2 * CHp * PW * Wp + 2 * OHp * CHp * Wp + CHp * PW)),
        transcendentals=0,
        bytes_accessed=int(N * CHp * PW * xsize + CHp * PW * csize + PW * Wp * csize
                           + OHp * CHp * csize + OHp * 4 + N * OHp * Wp * osize),
    )

    out3 = pl.pallas_call(
        _patch_embed_kernel,
        out_shape=jax.ShapeDtypeStruct((N, OHp, Wp), out_dtype),
        grid_spec=pltpu.PrefetchScalarGridSpec(
            num_scalar_prefetch=0,
            grid=(N, n_rows),
            in_specs=[
                pl.BlockSpec((1, CHp, PW), lambda n, t: (n, 0, 0)),  # x: fetched once/image
                pl.BlockSpec((CHp, PW), lambda n, t: (0, 0)),        # depthwise w (resident)
                pl.BlockSpec((PW, Wp), lambda n, t: (0, 0)),         # pooling mat (resident)
                pl.BlockSpec((TO, CHp), lambda n, t: (t, 0)),        # pointwise rows
                pl.BlockSpec((TO, 1), lambda n, t: (t, 0)),          # bias rows
            ],
            out_specs=pl.BlockSpec((1, TO, Wp), lambda n, t: (n, t, 0)),
        ),
        compiler_params=pltpu.CompilerParams(
            dimension_semantics=("parallel", "parallel"),
            vmem_limit_bytes=vmem_limit,
        ),
        cost_estimate=cost,
    )(x3, wd_full, pool, m_full, b_full)

    # ---- free reshape back to NCHW: no HBM traffic ----
    return out3.reshape(N, O, Hp, Wp)


def _reference(x, w_dw, b_dw, w_pw, b_pw, patch_size):
    """Pure-JAX reference of the depthwise->pointwise chain (correctness check)."""
    N, C, H, W = x.shape
    P = patch_size
    Hp, Wp = H // P, W // P
    O = w_pw.shape[0]
    xp = x.reshape(N, C, Hp, P, Wp, P)
    dw = jnp.einsum("nchpwq,cpq->nchw", xp, w_dw.reshape(C, P, P)) \
        + b_dw[None, :, None, None]
    pw = jnp.einsum("nchw,oc->nohw", dw, w_pw.reshape(O, C)) \
        + b_pw[None, :, None, None]
    return pw


if __name__ == "__main__":
    patch_size = 4
    img_size = 16
    in_channels = 4
    out_channels = 32
    batch = 2

    key = jax.random.PRNGKey(0)
    k_x, k_wdw, k_bdw, k_wpw, k_bpw = jax.random.split(key, 5)

    x = jax.random.normal(k_x, (batch, in_channels, img_size, img_size), jnp.float32)
    # depthwise conv weight: (C, 1, P, P); bias (C,)
    w_dw = jax.random.normal(k_wdw, (in_channels, 1, patch_size, patch_size), jnp.float32) * 0.1
    b_dw = jax.random.normal(k_bdw, (in_channels,), jnp.float32) * 0.1
    # pointwise conv weight: (O, C, 1, 1); bias (O,)
    w_pw = jax.random.normal(k_wpw, (out_channels, in_channels, 1, 1), jnp.float32) * 0.1
    b_pw = jax.random.normal(k_bpw, (out_channels,), jnp.float32) * 0.1

    ref = _reference(x, w_dw, b_dw, w_pw, b_pw, patch_size)
    expected_shape = (batch, out_channels, img_size // patch_size, img_size // patch_size)

    # 1) f32 compute, pointwise weight fully resident (grid = (N, 1)); tight tolerance.
    out_f32 = patch_embeddings_forward(
        x, w_dw, b_dw, w_pw, b_pw, patch_size=patch_size, compute_dtype=jnp.float32)
    out_f32 = jax.block_until_ready(out_f32)
    assert out_f32.shape == expected_shape
    assert jnp.allclose(out_f32, ref, atol=1e-5, rtol=1e-5), "f32 mismatch vs reference"

    # 2) f32 compute with an explicit output-row tile (exercises the v7x-style
    #    row-tiled grid: grid = (batch, 4)); tight tolerance.
    out_f32_t = patch_embeddings_forward(
        x, w_dw, b_dw, w_pw, b_pw, patch_size=patch_size,
        compute_dtype=jnp.float32, row_block=32)
    out_f32_t = jax.block_until_ready(out_f32_t)
    assert out_f32_t.shape == expected_shape
    assert jnp.allclose(out_f32_t, ref, atol=1e-5, rtol=1e-5), "row-tiled mismatch vs reference"

    # 3) default bf16 MXU path (f32 accumulate, f32 bias epilogue); looser tolerance.
    out_bf16 = patch_embeddings_forward(
        x, w_dw, b_dw, w_pw, b_pw, patch_size=patch_size)
    out_bf16 = jax.block_until_ready(out_bf16)
    assert out_bf16.shape == expected_shape
    assert jnp.allclose(out_bf16, ref, atol=2e-2, rtol=2e-2), "bf16 mismatch vs reference"

    print("KERNEL_OK")
</pallas_src>

<mosaic_0001>
module attributes {stable_mosaic.version = 11 : i64} {
  func.func @_patch_embed_kernel(%arg0: i32, %arg1: i32, %arg2: memref<1x16x64xf32, #tpu.memory_space<vmem>>, %arg3: memref<16x64xf32, #tpu.memory_space<vmem>>, %arg4: memref<64x4xf32, #tpu.memory_space<vmem>>, %arg5: memref<128x16xf32, #tpu.memory_space<vmem>>, %arg6: memref<128x1xf32, #tpu.memory_space<vmem>>, %arg7: memref<1x128x4xf32, #tpu.memory_space<vmem>>) attributes {dimension_semantics = [#tpu.dimension_semantics<parallel>, #tpu.dimension_semantics<parallel>], iteration_bounds = array<i64: 2, 1>, scalar_prefetch = 0 : i64, scratch_operands = 0 : i64, tpu.core_type = #tpu.core_type<tc>, window_params = [{transform_indices = @transform_0, window_bounds = array<i64: 1, 16, 64>}, {pipeline_mode = #tpu.pipeline_mode<synchronous>, transform_indices = @transform_1, window_bounds = array<i64: 16, 64>}, {pipeline_mode = #tpu.pipeline_mode<synchronous>, transform_indices = @transform_2, window_bounds = array<i64: 64, 4>}, {transform_indices = @transform_3, window_bounds = array<i64: 128, 16>}, {transform_indices = @transform_4, window_bounds = array<i64: 128, 1>}, {transform_indices = @transform_5, window_bounds = array<i64: 1, 128, 4>}]} {
    %c0 = arith.constant 0 : index
    %c0_0 = arith.constant 0 : index
    %c0_1 = arith.constant 0 : index
    %0 = vector.load %arg2[%c0, %c0_0, %c0_1] : memref<1x16x64xf32, #tpu.memory_space<vmem>>, vector<1x16x64xf32>
    %1 = vector.shape_cast %0 : vector<1x16x64xf32> to vector<16x64xf32>
    %c0_2 = arith.constant 0 : index
    %c0_3 = arith.constant 0 : index
    %2 = vector.load %arg3[%c0_2, %c0_3] : memref<16x64xf32, #tpu.memory_space<vmem>>, vector<16x64xf32>
    %3 = arith.mulf %1, %2 : vector<16x64xf32>
    %c0_4 = arith.constant 0 : index
    %c0_5 = arith.constant 0 : index
    %4 = vector.load %arg4[%c0_4, %c0_5] : memref<64x4xf32, #tpu.memory_space<vmem>>, vector<64x4xf32>
    %cst = arith.constant dense<0.000000e+00> : vector<16x4xf32>
    %5 = tpu.matmul %3, %4, %cst {dimension_numbers = #tpu.dot_dimension_numbers<[1], [0], [0], [1], [0, 0, 1, 1], [], []>} : vector<16x64xf32>, vector<64x4xf32>, vector<16x4xf32> -> vector<16x4xf32>
    %c0_6 = arith.constant 0 : index
    %c0_7 = arith.constant 0 : index
    %6 = vector.load %arg5[%c0_6, %c0_7] : memref<128x16xf32, #tpu.memory_space<vmem>>, vector<128x16xf32>
    %cst_8 = arith.constant dense<0.000000e+00> : vector<128x4xf32>
    %7 = tpu.matmul %6, %5, %cst_8 {dimension_numbers = #tpu.dot_dimension_numbers<[1], [0], [0], [1], [0, 0, 1, 1], [], []>} : vector<128x16xf32>, vector<16x4xf32>, vector<128x4xf32> -> vector<128x4xf32>
    %c0_9 = arith.constant 0 : index
    %c0_10 = arith.constant 0 : index
    %8 = vector.load %arg6[%c0_9, %c0_10] : memref<128x1xf32, #tpu.memory_space<vmem>>, vector<128x1xf32>
    %9 = vector.broadcast %8 : vector<128x1xf32> to vector<128x4xf32>
    %10 = arith.addf %7, %9 : vector<128x4xf32>
    %c0_11 = arith.constant 0 : index
    %c0_12 = arith.constant 0 : index
    %c0_13 = arith.constant 0 : index
    %11 = vector.load %arg7[%c0_11, %c0_12, %c0_13] : memref<1x128x4xf32, #tpu.memory_space<vmem>>, vector<1x128x4xf32>
    %12 = vector.shape_cast %11 : vector<1x128x4xf32> to vector<128x4xf32>
    %13 = vector.shape_cast %10 : vector<128x4xf32> to vector<1x128x4xf32>
    tpu.vector_store %arg7[%c0_11, %c0_12, %c0_13], %13 {strides = array<i32>} : memref<1x128x4xf32, #tpu.memory_space<vmem>>, vector<1x128x4xf32>,
    return
  }
  func.func @transform_0(%arg0: i32, %arg1: i32) -> (i32, i32, i32) {
    %c0_i32 = arith.constant 0 : i32
    %c0_i32_0 = arith.constant 0 : i32
    %c0_i32_1 = arith.constant 0 : i32
    return %arg0, %c0_i32, %c0_i32_0 : i32, i32, i32
  }
  func.func @transform_1(%arg0: i32, %arg1: i32) -> (i32, i32) {
    %c0_i32 = arith.constant 0 : i32
    %c0_i32_0 = arith.constant 0 : i32
    %c0_i32_1 = arith.constant 0 : i32
    return %c0_i32, %c0_i32_0 : i32, i32
  }
  func.func @transform_2(%arg0: i32, %arg1: i32) -> (i32, i32) {
    %c0_i32 = arith.constant 0 : i32
    %c0_i32_0 = arith.constant 0 : i32
    %c0_i32_1 = arith.constant 0 : i32
    return %c0_i32, %c0_i32_0 : i32, i32
  }
  func.func @transform_3(%arg0: i32, %arg1: i32) -> (i32, i32) {
    %c0_i32 = arith.constant 0 : i32
    %c0_i32_0 = arith.constant 0 : i32
    return %arg1, %c0_i32 : i32, i32
  }
  func.func @transform_4(%arg0: i32, %arg1: i32) -> (i32, i32) {
    %c0_i32 = arith.constant 0 : i32
    %c0_i32_0 = arith.constant 0 : i32
    return %arg1, %c0_i32 : i32, i32
  }
  func.func @transform_5(%arg0: i32, %arg1: i32) -> (i32, i32, i32) {
    %c0_i32 = arith.constant 0 : i32
    %c0_i32_0 = arith.constant 0 : i32
    return %arg0, %arg1, %c0_i32 : i32, i32, i32
  }
}

</mosaic_0001>

<bundles_post_ra>
// kernel: patch_embeddings_forward.1
= control target key start
LH: loop header
LB: loop body
LE: loop exit
PB: predicated region body
PF: predicated region fallthrough
CT: control target
= control target key end

     0   :  { %s1034_s18 = smov 0   ;;  %s1036_s19 = smov 0   ;;  %s1247_s0 = inlined_call_operand.vmem [shape: f32[2,16,64], index: 0, kind: input, shape index: {}]   ;;  %s1248_s1 = inlined_call_operand.vmem [shape: f32[16,64], index: 1, kind: input, shape index: {}]   ;;  %s1249_s2 = inlined_call_operand.vmem [shape: f32[64,4], index: 2, kind: input, shape index: {}]   ;;  %s1250_s3 = inlined_call_operand.vmem [shape: f32[128,16], index: 3, kind: input, shape index: {}]   ;;  %s1251_s4 = inlined_call_operand.vmem [shape: f32[128,1], index: 4, kind: input, shape index: {}]   ;;  %s1252_s5 = inlined_call_operand.vmem [shape: f32[2,128,4], index: 5, kind: output, shape index: {}]  }
   0x1   :  { %s1038_s20 = smov 0  }
   0x2 LB: > { %s27_s21 = sadd.s32 1, %s997_s19  ;;  %p828_p0 = scmp.ge.s32.totalorder %s1001_s20, 1  ;;  %s1001_s20 = sphi %s1038_s20, %s15_s20   ;;  %s997_s19 = sphi %s1036_s19, %s1254_s19   ;;  %s993_s18 = sphi %s1034_s18, %s1253_s18  }
   0x3   : > { %p29_p1 = scmp.ge.s32.totalorder %s27_s21, 2  ;;  %p223_p2 = scmp.lt.s32.totalorder %s1001_s20, 3 }
   0x5   : > { %s1256_s21 = smov (%p29_p1, %s27_s21), 0  ;;  %p224_p3 = pnand %p828_p0, %p223_p2 }
   0x6   : > { %v298_v0 = vld [vmem:[%s1249_s2] sm:$0xff] (!%p224_p3)  ;;  %v299_v1 = vld [vmem:[%s1249_s2 + $0x8] sm:$0xff] (!%p224_p3)  ;;  %v300_v2 = vld [vmem:[%s1249_s2 + $0x10] sm:$0xff] (!%p224_p3)  ;;  %p265_p4 = scmp.lt.s32.totalorder (!%p224_p3), %s993_s18, 1  ;;  %vm306_vm0 = vcmask (!%p224_p3), 523264   ;;  %vm500_vm1 = vcmask (!%p224_p3), 130048  }
   0x7   : > { %227 = sbr.rel (%p224_p3) target bundleno = 480 (0x1e0), region = 40  ;;  %v930_v3 = vpack.c.bf16 (!%p224_p3), %v299_v1, %v298_v0  ;;  %v301_v4 = vld [vmem:[%s1249_s2 + $0x18] sm:$0xff] (!%p224_p3)  ;;  %v302_v6 = vld [vmem:[%s1249_s2 + $0x20] sm:$0xff] (!%p224_p3)  ;;  %v303_v7 = vld [vmem:[%s1249_s2 + $0x28] sm:$0xff] (!%p224_p3)  ;;  %v1003_v22 = vmov (!%p224_p3), 0   ;;  %vm694_vm2 = vcmask (!%p224_p3), 31744  }
   0x8   : > { %v934_v5 = vpack.c.bf16 (!%p224_p3), %v301_v4, %v300_v2  ;;  %v294_v8 = vld [vmem:[%s1248_s1] sm:$0xff] (!%p224_p3)  ;;  %v938_v9 = vpack.c.bf16 (!%p224_p3), %v303_v7, %v302_v6  ;;  %v304_v10 = vld [vmem:[%s1249_s2 + $0x30] sm:$0xff] (!%p224_p3)  ;;  %v305_v11 = vld [vmem:[%s1249_s2 + $0x38] sm:$0xff] (!%p224_p3)  ;;  %978 = vset.pattern.permute.xlu1 (!%p224_p3), %v1003_v22  ;;  %977 = vset.pattern.permute.xlu0 (!%p224_p3), %v1003_v22 }
   0x9   : > { %931 = vmatprep.subr.bf16.mxu0 (!%p224_p3), %v930_v3  ;;  %v942_v14 = vpack.c.bf16 (!%p224_p3), %v305_v11, %v304_v10  ;;  %v295_v16 = vld [vmem:[%s1248_s1 + $0x8] sm:$0xff] (!%p224_p3)  ;;  %v388_v18 = vld [vmem:[%s1250_s3] sm:$0xff] (!%p224_p3)  ;;  %v406_v20 = vld [vmem:[%s1251_s4 + $0x10] sm:$0xff] (!%p224_p3) }
   0xa   : > { %933 = vmatpush3.bf16.msra.mxu0 (!%p224_p3), %v930_v3  ;;  %v392_v19 = vld [vmem:[%s1250_s3 + $0x20] sm:$0xff] (!%p224_p3)  ;;  %432 = vperm.xlu1 (!%p224_p3), %978, %v406_v20   ;;  %v407_v23 = vld [vmem:[%s1251_s4 + $0x18] sm:$0xff] (!%p224_p3)  ;;  %v405_v24 = vld [vmem:[%s1251_s4 + $0x8] sm:$0xff] (!%p224_p3) }
   0xb   : > { %935 = vmatprep.subr.bf16.mxu0 (!%p224_p3), %v934_v5  ;;  %912 = vmatprep.mubr.msk.f32.mxu1 (!%p224_p3), %vm500_vm1, %v392_v19  ;;  %v404_v21 = vld [vmem:[%s1251_s4] sm:$0xff] (!%p224_p3)  ;;  %v409_v25 = vld [vmem:[%s1251_s4 + $0x28] sm:$0xff] (!%p224_p3)  ;;  %v411_v27 = vld [vmem:[%s1251_s4 + $0x38] sm:$0xff] (!%p224_p3) }
   0xc   : > { %422 = vperm.xlu0 (!%p224_p3), %977, %v404_v21   ;;  %v408_v26 = vld [vmem:[%s1251_s4 + $0x20] sm:$0xff] (!%p224_p3)  ;;  %v410_v28 = vld [vmem:[%s1251_s4 + $0x30] sm:$0xff] (!%p224_p3)  ;;  %v413_v29 = vld [vmem:[%s1251_s4 + $0x48] sm:$0xff] (!%p224_p3) }
   0xd   : > { %v412_v30 = vld [vmem:[%s1251_s4 + $0x40] sm:$0xff] (!%p224_p3)  ;;  %v415_v31 = vld [vmem:[%s1251_s4 + $0x58] sm:$0xff] (!%p224_p3)  ;;  %v414_v32 = vld [vmem:[%s1251_s4 + $0x50] sm:$0xff] (!%p224_p3) }
   0xe   : > { %s1258_s18 = smov (!%p265_p4, %s993_s18), 1  ;;  %937 = vmatpush3.bf16.msra.mxu0 %v934_v5  ;;  %437 = vperm.xlu1 %978, %v407_v23   ;;  %v417_v33 = vld [vmem:[%s1251_s4 + $0x68] sm:$0xff]  ;;  %v416_v34 = vld [vmem:[%s1251_s4 + $0x60] sm:$0xff]  ;;  %v419_v35 = vld [vmem:[%s1251_s4 + $0x78] sm:$0xff] }
   0xf   : > { %s853_s9 = sshll.u32 %s1258_s18, 4  ;;  %939 = vmatprep.subr.bf16.mxu0 %v938_v9  ;;  %v418_v36 = vld [vmem:[%s1251_s4 + $0x70] sm:$0xff]  ;;  %v389_v40 = vld [vmem:[%s1250_s3 + $0x8] sm:$0xff]  ;;  %v391_v44 = vld [vmem:[%s1250_s3 + $0x18] sm:$0xff]  ;;  %s854_s26 = sshll.u32 %s1258_s18, 7 }
  0x10   : > { %s269_s14 = scalar_lea.vmem %s1247_s0, %s853_s9  ;;  %427 = vperm.xlu0 %977, %v405_v24   ;;  %v393_v41 = vld [vmem:[%s1250_s3 + $0x28] sm:$0xff]  ;;  %v390_v42 = vld [vmem:[%s1250_s3 + $0x10] sm:$0xff]  ;;  %v395_v45 = vld [vmem:[%s1250_s3 + $0x38] sm:$0xff]  ;;  %s1204_s29 = scalar_lea.vmem %s1252_s5, %s854_s26 }
  0x11   : > { %v292_v12 = vld [vmem:[%s269_s14] sm:$0xff]  ;;  %v293_v15 = vld [vmem:[%s269_s14 + $0x8] sm:$0xff]  ;;  %v394_v43 = vld [vmem:[%s1250_s3 + $0x30] sm:$0xff] }
  0x12   : > { %v296_v13 = vmul.f32 %v294_v8, %v292_v12  ;;  %941 = vmatpush3.bf16.msra.mxu0 %v938_v9  ;;  %v297_v17 = vmul.f32 %v295_v16, %v293_v15  ;;  %447 = vperm.xlu1 %978, %v409_v25   ;;  %v396_v46 = vld [vmem:[%s1250_s3 + $0x40] sm:$0xff]  ;;  %v397_v47 = vld [vmem:[%s1250_s3 + $0x48] sm:$0xff]  ;;  %v398_v48 = vld [vmem:[%s1250_s3 + $0x50] sm:$0xff] }
  0x13   : > { %943 = vmatprep.subr.bf16.mxu0 %v942_v14  ;;  %v399_v49 = vld [vmem:[%s1250_s3 + $0x58] sm:$0xff]  ;;  %v400_v50 = vld [vmem:[%s1250_s3 + $0x60] sm:$0xff]  ;;  %v401_v51 = vld [vmem:[%s1250_s3 + $0x68] sm:$0xff] }
  0x14   : > { %899 = vmatprep.mubr.msk.f32.mxu0 %vm306_vm0, %v296_v13  ;;  %442 = vperm.xlu0 %977, %v408_v26   ;;  %v402_v52 = vld [vmem:[%s1250_s3 + $0x70] sm:$0xff]  ;;  %v403_v53 = vld [vmem:[%s1250_s3 + $0x78] sm:$0xff] }
  0x16   : > { %945 = vmatpush3.bf16.msra.mxu0 %v942_v14  ;;  %457 = vperm.xlu1 %978, %v411_v27  }
  0x18   : > { %452 = vperm.xlu0 %977, %v410_v28  }
  0x19   : > { %900 = vmatmul.mubr.msk.f32.vlgmr.msra.gmra.mrb[0].mxu0 %vm306_vm0, %v297_v17 }
  0x1a   : > { %906 = vmatprep.mubr.msk.f32.mxu0 %vm500_vm1, %v388_v18  ;;  %467 = vperm.xlu1 %978, %v413_v29  }
  0x1c   : > { %462 = vperm.xlu0 %977, %v412_v30  }
  0x1e   : > { %477 = vperm.xlu1 %978, %v415_v31  }
  0x20   : > { %472 = vperm.xlu0 %977, %v414_v32  }
  0x22   : > { %487 = vperm.xlu1 %978, %v417_v33  }
  0x24   : > { %482 = vperm.xlu0 %977, %v416_v34  }
  0x26   : > { %497 = vperm.xlu1 %978, %v419_v35  }
  0x28   : > { %492 = vperm.xlu0 %977, %v418_v36  }
  0x89   : > { %v433_v54 = vpop.permute.xlu1 %432 }
  0x8b   : > { %v423_v55 = vpop.permute.xlu0 %422 }
  0x8d   : > { %v438_v56 = vpop.permute.xlu1 %437 }
  0x8f   : > { %v428_v57 = vpop.permute.xlu0 %427 }
  0x91   : > { %v448_v58 = vpop.permute.xlu1 %447 }
  0x93   : > { %v443_v59 = vpop.permute.xlu0 %442 }
  0x95   : > { %v458_v60 = vpop.permute.xlu1 %457 }
  0x97   : > { %v453_v61 = vpop.permute.xlu0 %452 }
  0x99   : > { %v468_v4 = vpop.permute.xlu1 %467 }
  0x9b   : > { %v463_v7 = vpop.permute.xlu0 %462 }
  0x9d   : > { %v478_v16 = vpop.permute.xlu1 %477 }
  0x9f   : > { %v473_v18 = vpop.permute.xlu0 %472 }
  0xa1   : > { %v488_v25 = vpop.permute.xlu1 %487 }
  0xa3   : > { %v483_v27 = vpop.permute.xlu0 %482 }
  0xa5   : > { %v498_v32 = vpop.permute.xlu1 %497 }
  0xa7   : > { %v493_v34 = vpop.permute.xlu0 %492 }
  0xec   : > { %v901_v37 = vpop.f32.mrb[0].mxu0 }
  0xed   : > { %v379_v38 = vpop.f32.mrb[1].mxu0 }
  0xee   : > { %v946_v39 = vpack.c.bf16 %v901_v37, %v379_v38 }
  0xf0   : > { %947 = vmatprep.subr.bf16.mxu0 %v946_v39  ;;  %950 = vmatprep.subr.bf16.mxu1 %v946_v39 }
  0xf1   : > { %949 = vmatpush3.bf16.msra.mxu0 %v946_v39  ;;  %951 = vmatpush3.bf16.msra.mxu1 %v946_v39 }
  0xf4   : > { %907 = vmatmul.mubr.msk.f32.vlgmr.msra.gmra.mrb[2].mxu0 %vm500_vm1, %v389_v40  ;;  %913 = vmatmul.mubr.msk.f32.vlgmr.msra.gmra.mrb[0].mxu1 %vm500_vm1, %v393_v41 }
  0xf5   : > { %909 = vmatprep.mubr.msk.f32.mxu0 %vm500_vm1, %v390_v42  ;;  %915 = vmatprep.mubr.msk.f32.mxu1 %vm500_vm1, %v394_v43 }
  0xf8   : > { %910 = vmatmul.mubr.msk.f32.gmra.mrb[4].mxu0 %vm500_vm1, %v391_v44  ;;  %916 = vmatmul.mubr.msk.f32.gmra.mrb[2].mxu1 %vm500_vm1, %v395_v45 }
  0xf9   : > { %918 = vmatprep.mubr.msk.f32.mxu1 %vm500_vm1, %v396_v46 }
  0xfc   : > { %919 = vmatmul.mubr.msk.f32.gmra.mrb[4].mxu1 %vm500_vm1, %v397_v47 }
  0xfd   : > { %921 = vmatprep.mubr.msk.f32.mxu1 %vm500_vm1, %v398_v48 }
 0x100   : > { %922 = vmatmul.mubr.msk.f32.gmra.mrb[6].mxu1 %vm500_vm1, %v399_v49 }
 0x101   : > { %924 = vmatprep.mubr.msk.f32.mxu1 %vm500_vm1, %v400_v50 }
 0x104   : > { %925 = vmatmul.mubr.msk.f32.gmra.mrb[8].mxu1 %vm500_vm1, %v401_v51 }
 0x105   : > { %927 = vmatprep.mubr.msk.f32.mxu1 %vm500_vm1, %v402_v52 }
 0x108   : > { %928 = vmatmul.mubr.msk.f32.gmra.mrb[10].mxu1 %vm500_vm1, %v403_v53 }
 0x1c7   : > { %v908_v62 = vpop.f32.mrb[2].mxu0  ;;  %v914_v63 = vpop.f32.mrb[0].mxu1 }
 0x1c8   : > { %v621_v0 = vadd.f32 %v908_v62, %v428_v57  ;;  %v641_v1 = vadd.f32 %v914_v63, %v448_v58  ;;  %v615_v2 = vpop.f32.mrb[3].mxu0  ;;  %v635_v3 = vpop.f32.mrb[1].mxu1 }
 0x1c9   : > { %v616_v5 = vadd.f32 %v615_v2, %v423_v55  ;;  %v636_v6 = vadd.f32 %v635_v3, %v443_v59 }
 0x1ca   : > { %696 = vst.msk [vmem:[%s1204_s29 + $0x8] sm:$0xff] %vm694_vm2, %v621_v0  ;;  %700 = vst.msk [vmem:[%s1204_s29 + $0x28] sm:$0xff] %vm694_vm2, %v641_v1 }
 0x1cb   : > { %695 = vst.msk [vmem:[%s1204_s29] sm:$0xff] %vm694_vm2, %v616_v5  ;;  %699 = vst.msk [vmem:[%s1204_s29 + $0x20] sm:$0xff] %vm694_vm2, %v636_v6  ;;  %v911_v8 = vpop.f32.mrb[4].mxu0  ;;  %v917_v9 = vpop.f32.mrb[2].mxu1 }
 0x1cc   : > { %v631_v10 = vadd.f32 %v911_v8, %v438_v56  ;;  %v651_v11 = vadd.f32 %v917_v9, %v458_v60  ;;  %v625_v12 = vpop.f32.mrb[5].mxu0  ;;  %v645_v13 = vpop.f32.mrb[3].mxu1 }
 0x1cd   : > { %v626_v14 = vadd.f32 %v625_v12, %v433_v54  ;;  %v646_v15 = vadd.f32 %v645_v13, %v453_v61 }
 0x1ce   : > { %698 = vst.msk [vmem:[%s1204_s29 + $0x18] sm:$0xff] %vm694_vm2, %v631_v10  ;;  %702 = vst.msk [vmem:[%s1204_s29 + $0x38] sm:$0xff] %vm694_vm2, %v651_v11 }
 0x1cf   : > { %697 = vst.msk [vmem:[%s1204_s29 + $0x10] sm:$0xff] %vm694_vm2, %v626_v14  ;;  %701 = vst.msk [vmem:[%s1204_s29 + $0x30] sm:$0xff] %vm694_vm2, %v646_v15  ;;  %v920_v17 = vpop.f32.mrb[4].mxu1 }
 0x1d0   : > { %v661_v19 = vadd.f32 %v920_v17, %v468_v4  ;;  %v655_v20 = vpop.f32.mrb[5].mxu1 }
 0x1d1   : > { %v656_v21 = vadd.f32 %v655_v20, %v463_v7 }
 0x1d2   : > { %704 = vst.msk [vmem:[%s1204_s29 + $0x48] sm:$0xff] %vm694_vm2, %v661_v19 }
 0x1d3   : > { %703 = vst.msk [vmem:[%s1204_s29 + $0x40] sm:$0xff] %vm694_vm2, %v656_v21  ;;  %v923_v22 = vpop.f32.mrb[6].mxu1 }
 0x1d4   : > { %v671_v23 = vadd.f32 %v923_v22, %v478_v16  ;;  %v665_v24 = vpop.f32.mrb[7].mxu1 }
 0x1d5   : > { %v666_v26 = vadd.f32 %v665_v24, %v473_v18 }
 0x1d6   : > { %706 = vst.msk [vmem:[%s1204_s29 + $0x58] sm:$0xff] %vm694_vm2, %v671_v23 }
 0x1d7   : > { %705 = vst.msk [vmem:[%s1204_s29 + $0x50] sm:$0xff] %vm694_vm2, %v666_v26  ;;  %v926_v28 = vpop.f32.mrb[8].mxu1 }
 0x1d8   : > { %v681_v29 = vadd.f32 %v926_v28, %v488_v25  ;;  %v675_v30 = vpop.f32.mrb[9].mxu1 }
 0x1d9   : > { %v676_v31 = vadd.f32 %v675_v30, %v483_v27 }
 0x1da   : > { %708 = vst.msk [vmem:[%s1204_s29 + $0x68] sm:$0xff] %vm694_vm2, %v681_v29 }
 0x1db   : > { %707 = vst.msk [vmem:[%s1204_s29 + $0x60] sm:$0xff] %vm694_vm2, %v676_v31  ;;  %v929_v33 = vpop.f32.mrb[10].mxu1 }
 0x1dc   : > { %v691_v35 = vadd.f32 %v929_v33, %v498_v32  ;;  %v685_v36 = vpop.f32.mrb[11].mxu1 }
 0x1dd   : > { %v686_v37 = vadd.f32 %v685_v36, %v493_v34 }
 0x1de   : > { %710 = vst.msk [vmem:[%s1204_s29 + $0x78] sm:$0xff] %vm694_vm2, %v691_v35 }
 0x1df   : > { %709 = vst.msk [vmem:[%s1204_s29 + $0x70] sm:$0xff] %vm694_vm2, %v686_v37 }
 0x1e0 PF: > { %s15_s20 = sadd.s32 1, %s1001_s20   ;;  %s1253_s18 = smov %s997_s19 }
 0x1e1   : > { %p12_p5 = scmp.ge.s32.totalorder %s15_s20, 4   ;;  %s1254_s19 = smov %s1256_s21 }
 0x1e3   :  { %14 = sbr.rel (!%p12_p5) target bundleno = 2 (0x2), region = 76 }

</bundles_post_ra>
